<compile_context>
chip_gen: v7x
topology: tpu7x:2x2x1
jax: 0.10.0
libtpu: 0.0.40
codegen_flags: <defaults>
</compile_context>

<pallas_src>
import functools
import math

import jax
import jax.numpy as jnp
from jax import lax
from jax.experimental import pallas as pl
from jax.experimental.pallas import tpu as pltpu


def _sdpa_kernel(q_ref, k_ref, v_ref, mask_ref,
                 scores_ref, ctx_ref, attn_ref, *, scale):
    # One (batch*head, query-tile) slice per grid step.
    # Fold 1/sqrt(d_k) into Q (TQ*D multiplies instead of TQ*S).
    q = (q_ref[0].astype(jnp.float32) * scale).astype(jnp.bfloat16)   # (TQ, D)
    k = k_ref[0]                                                      # (S, D) bf16
    v = v_ref[0]                                                      # (S, D) bf16

    # scores = (Q/sqrt(d_k)) @ K^T via dot_general contracting the last dims:
    # the MXU consumes K in its natural layout, no explicit transpose.
    scores = lax.dot_general(
        q, k,
        dimension_numbers=(((1,), (1,)), ((), ())),
        preferred_element_type=jnp.float32)                           # (TQ, S) f32

    # masked_fill_(attn_mask, -1e9).  mask block is (TQ, S) or (1, S) int8;
    # widen i8 -> i32 (cheap, well-supported unpack) then compare+select.
    mask = mask_ref[0].astype(jnp.int32) != 0
    scores = jnp.where(mask, jnp.float32(-1e9), scores)
    scores_ref[0] = scores

    # Softmax along keys, numerically stabilized, all f32 (v5e has no bf16 VPU/EUP).
    m = jnp.max(scores, axis=-1, keepdims=True)
    e = jnp.exp(scores - m)
    attn = e * pl.reciprocal(jnp.sum(e, axis=-1, keepdims=True), approx=True)
    attn_ref[0] = attn

    # context = attn @ V  (bf16 MXU inputs, f32 accumulation).
    ctx_ref[0] = jnp.dot(attn.astype(jnp.bfloat16), v,
                         preferred_element_type=jnp.float32).astype(ctx_ref.dtype)


def _pick_tq(S):
    """Largest query tile (divides S, multiple of 8) whose two f32 (TQ, S)
    output blocks stay within ~24 MiB when double-buffered."""
    budget = 24 * 1024 * 1024
    for tq in (512, 256, 128, 64, 32, 16, 8):
        if S % tq == 0 and 2 * 2 * 4 * tq * S <= budget:
            return tq
    return S


def scaled_dot_product_attention(Q, K, V, attn_mask):
    """Q, K, V: [B, H, S, D] float32.
    attn_mask: bool/int, either [B, H, S, S] (general, or anything broadcastable)
    or [B, 1, 1, S] (key-only padding mask; True / nonzero => masked)."""
    B, H, S, D = Q.shape
    BH = B * H
    TQ = _pick_tq(S)

    # bf16 matmul operands: halves Q/K/V DMA bytes and doubles MXU throughput.
    q = Q.reshape(BH, S, D).astype(jnp.bfloat16)
    k = K.reshape(BH, S, D).astype(jnp.bfloat16)
    v = V.reshape(BH, S, D).astype(jnp.bfloat16)

    m = attn_mask
    if (m.ndim == 4 and m.shape[0] in (1, B) and m.shape[1] == 1
            and m.shape[2] == 1 and m.shape[3] == S):
        # Key-only padding mask: ship one int8 row per batch and broadcast
        # inside the kernel -- removes the S^2 (and H x) mask HBM traffic.
        mask = jnp.broadcast_to(m, (B, 1, 1, S)).reshape(B, 1, S).astype(jnp.int8)
        mask_spec = pl.BlockSpec((1, 1, S), lambda bh, qi: (bh // H, 0, 0))
    else:
        # General mask: keep it, but as int8 (4x fewer bytes than int32).
        mask = jnp.broadcast_to(m, (B, H, S, S)).reshape(BH, S, S).astype(jnp.int8)
        mask_spec = pl.BlockSpec((1, TQ, S), lambda bh, qi: (bh, qi, 0))

    scale = 1.0 / math.sqrt(D)
    kernel = functools.partial(_sdpa_kernel, scale=scale)

    q_spec = pl.BlockSpec((1, TQ, D), lambda bh, qi: (bh, qi, 0))
    kv_spec = pl.BlockSpec((1, S, D), lambda bh, qi: (bh, 0, 0))   # constant over qi
    ss_spec = pl.BlockSpec((1, TQ, S), lambda bh, qi: (bh, qi, 0))
    ctx_spec = pl.BlockSpec((1, TQ, D), lambda bh, qi: (bh, qi, 0))

    scores, ctx, attn = pl.pallas_call(
        kernel,
        out_shape=(
            jax.ShapeDtypeStruct((BH, S, S), jnp.float32),  # scores
            jax.ShapeDtypeStruct((BH, S, D), jnp.float32),  # context
            jax.ShapeDtypeStruct((BH, S, S), jnp.float32),  # attn
        ),
        grid_spec=pltpu.PrefetchScalarGridSpec(
            num_scalar_prefetch=0,
            grid=(BH, S // TQ),
            in_specs=[q_spec, kv_spec, kv_spec, mask_spec],
            out_specs=(ss_spec, ctx_spec, ss_spec),
        ),
        compiler_params=pltpu.CompilerParams(
            # bh parallel (megacore shards heads); qi sequential so the
            # index-map-constant K/V blocks are fetched once per head.
            dimension_semantics=("parallel", "arbitrary"),
            vmem_limit_bytes=48 * 1024 * 1024,
        ),
    )(q, k, v, mask)

    # TODO(synk): if callers never consume raw pre-softmax scores, drop that
    # output (or emit it bf16) -- it is half of the S^2 HBM writeback.
    return (scores.reshape(B, H, S, S),
            ctx.reshape(B, H, S, D),
            attn.reshape(B, H, S, S))


def _reference(Q, K, V, attn_mask):
    D = Q.shape[-1]
    scores = jnp.einsum("bhqd,bhkd->bhqk", Q, K) / math.sqrt(D)
    scores = jnp.where(attn_mask, -1e9, scores)
    attn = jax.nn.softmax(scores, axis=-1)
    ctx = jnp.einsum("bhqk,bhkd->bhqd", attn, V)
    return scores, ctx, attn


if __name__ == "__main__":
    key = jax.random.PRNGKey(0)
    kq, kk, kv = jax.random.split(key, 3)

    B, H, S, D = 2, 2, 8, 32
    Q = jax.random.normal(kq, (B, H, S, D), dtype=jnp.float32)
    K = jax.random.normal(kk, (B, H, S, D), dtype=jnp.float32)
    V = jax.random.normal(kv, (B, H, S, D), dtype=jnp.float32)

    # Typical BERT padding mask: mask out the last 2 key positions.
    pad = jnp.zeros((S,), dtype=bool).at[-2:].set(True)
    mask_full = jnp.broadcast_to(pad[None, None, None, :], (B, H, S, S))
    mask_keyonly = jnp.broadcast_to(pad[None, None, None, :], (B, 1, 1, S))

    r_scores, r_ctx, r_attn = _reference(Q, K, V, mask_full)

    # General [B,H,S,S] mask path (matches the PyTorch module's signature).
    scores, ctx, attn = scaled_dot_product_attention(Q, K, V, mask_full)
    jax.block_until_ready((scores, ctx, attn))
    # bf16 matmul inputs -> loosen tolerances accordingly (softmax stays f32).
    assert jnp.allclose(scores, r_scores, atol=5e-2, rtol=5e-2)
    assert jnp.allclose(attn, r_attn, atol=3e-2, rtol=3e-2)
    assert jnp.allclose(ctx, r_ctx, atol=1e-1, rtol=5e-2)

    # Fast key-only padding-mask path ([B,1,1,S]) -- avoids the S^2 mask DMA.
    scores2, ctx2, attn2 = scaled_dot_product_attention(Q, K, V, mask_keyonly)
    jax.block_until_ready((scores2, ctx2, attn2))
    assert jnp.allclose(scores2, r_scores, atol=5e-2, rtol=5e-2)
    assert jnp.allclose(attn2, r_attn, atol=3e-2, rtol=3e-2)
    assert jnp.allclose(ctx2, r_ctx, atol=1e-1, rtol=5e-2)

    print("KERNEL_OK")
</pallas_src>

<mosaic_0001>
module attributes {stable_mosaic.version = 11 : i64} {
  func.func @_sdpa_kernel(%arg0: i32, %arg1: i32, %arg2: memref<1x8x32xbf16, #tpu.memory_space<vmem>>, %arg3: memref<1x8x32xbf16, #tpu.memory_space<vmem>>, %arg4: memref<1x8x32xbf16, #tpu.memory_space<vmem>>, %arg5: memref<1x8x8xi8, #tpu.memory_space<vmem>>, %arg6: memref<1x8x8xf32, #tpu.memory_space<vmem>>, %arg7: memref<1x8x32xf32, #tpu.memory_space<vmem>>, %arg8: memref<1x8x8xf32, #tpu.memory_space<vmem>>) attributes {dimension_semantics = [#tpu.dimension_semantics<parallel>, #tpu.dimension_semantics<arbitrary>], iteration_bounds = array<i64: 4, 1>, scalar_prefetch = 0 : i64, scratch_operands = 0 : i64, tpu.core_type = #tpu.core_type<tc>, window_params = [{transform_indices = @transform_0, window_bounds = array<i64: 1, 8, 32>}, {transform_indices = @transform_1, window_bounds = array<i64: 1, 8, 32>}, {transform_indices = @transform_2, window_bounds = array<i64: 1, 8, 32>}, {transform_indices = @transform_3, window_bounds = array<i64: 1, 8, 8>}, {transform_indices = @transform_4, window_bounds = array<i64: 1, 8, 8>}, {transform_indices = @transform_5, window_bounds = array<i64: 1, 8, 32>}, {transform_indices = @transform_6, window_bounds = array<i64: 1, 8, 8>}]} {
    %c0 = arith.constant 0 : index
    %c0_0 = arith.constant 0 : index
    %c0_1 = arith.constant 0 : index
    %0 = vector.load %arg2[%c0, %c0_0, %c0_1] : memref<1x8x32xbf16, #tpu.memory_space<vmem>>, vector<1x8x32xbf16>
    %1 = vector.shape_cast %0 : vector<1x8x32xbf16> to vector<8x32xbf16>
    %2 = arith.extf %1 : vector<8x32xbf16> to vector<8x32xf32>
    %cst = arith.constant 0.176776692 : f32
    %3 = vector.broadcast %cst : f32 to vector<8x32xf32>
    %4 = arith.mulf %2, %3 : vector<8x32xf32>
    %5 = arith.truncf %4 : vector<8x32xf32> to vector<8x32xbf16>
    %c0_2 = arith.constant 0 : index
    %c0_3 = arith.constant 0 : index
    %c0_4 = arith.constant 0 : index
    %6 = vector.load %arg3[%c0_2, %c0_3, %c0_4] : memref<1x8x32xbf16, #tpu.memory_space<vmem>>, vector<1x8x32xbf16>
    %7 = vector.shape_cast %6 : vector<1x8x32xbf16> to vector<8x32xbf16>
    %c0_5 = arith.constant 0 : index
    %c0_6 = arith.constant 0 : index
    %c0_7 = arith.constant 0 : index
    %8 = vector.load %arg4[%c0_5, %c0_6, %c0_7] : memref<1x8x32xbf16, #tpu.memory_space<vmem>>, vector<1x8x32xbf16>
    %9 = vector.shape_cast %8 : vector<1x8x32xbf16> to vector<8x32xbf16>
    %cst_8 = arith.constant dense<0.000000e+00> : vector<8x8xf32>
    %10 = tpu.matmul %5, %7, %cst_8 {dimension_numbers = #tpu.dot_dimension_numbers<[1], [1], [0], [0], [0, 0, 1, 0], [], []>} : vector<8x32xbf16>, vector<8x32xbf16>, vector<8x8xf32> -> vector<8x8xf32>
    %c0_9 = arith.constant 0 : index
    %c0_10 = arith.constant 0 : index
    %c0_11 = arith.constant 0 : index
    %11 = vector.load %arg5[%c0_9, %c0_10, %c0_11] : memref<1x8x8xi8, #tpu.memory_space<vmem>>, vector<1x8x8xi8>
    %12 = vector.shape_cast %11 : vector<1x8x8xi8> to vector<8x8xi8>
    %13 = arith.extsi %12 : vector<8x8xi8> to vector<8x8xi32>
    %c0_i32 = arith.constant 0 : i32
    %14 = vector.broadcast %c0_i32 : i32 to vector<8x8xi32>
    %15 = arith.cmpi ne, %13, %14 : vector<8x8xi32>
    %cst_12 = arith.constant -1.000000e+09 : f32
    %16 = vector.broadcast %cst_12 : f32 to vector<8x8xf32>
    %17 = arith.select %15, %16, %10 : vector<8x8xi1>, vector<8x8xf32>
    %c0_13 = arith.constant 0 : index
    %c0_14 = arith.constant 0 : index
    %c0_15 = arith.constant 0 : index
    %18 = vector.load %arg6[%c0_13, %c0_14, %c0_15] : memref<1x8x8xf32, #tpu.memory_space<vmem>>, vector<1x8x8xf32>
    %19 = vector.shape_cast %18 : vector<1x8x8xf32> to vector<8x8xf32>
    %20 = vector.shape_cast %17 : vector<8x8xf32> to vector<1x8x8xf32>
    tpu.vector_store %arg6[%c0_13, %c0_14, %c0_15], %20 {strides = array<i32>} : memref<1x8x8xf32, #tpu.memory_space<vmem>>, vector<1x8x8xf32>,
    %cst_16 = arith.constant dense<0xFF800000> : vector<8xf32>
    %21 = vector.multi_reduction <maximumf>, %17, %cst_16 [1] : vector<8x8xf32> to vector<8xf32>
    %22 = vector.shape_cast %21 : vector<8xf32> to vector<8x1xf32>
    %23 = vector.broadcast %22 : vector<8x1xf32> to vector<8x8xf32>
    %24 = arith.subf %17, %23 : vector<8x8xf32>
    %25 = math.exp %24 : vector<8x8xf32>
    %cst_17 = arith.constant dense<0.000000e+00> : vector<8xf32>
    %26 = vector.multi_reduction <add>, %25, %cst_17 [1] : vector<8x8xf32> to vector<8xf32>
    %27 = vector.shape_cast %26 : vector<8xf32> to vector<8x1xf32>
    %28 = tpu.reciprocal %27 {approx = true} : vector<8x1xf32> -> vector<8x1xf32>
    %29 = vector.broadcast %28 : vector<8x1xf32> to vector<8x8xf32>
    %30 = arith.mulf %25, %29 : vector<8x8xf32>
    %c0_18 = arith.constant 0 : index
    %c0_19 = arith.constant 0 : index
    %c0_20 = arith.constant 0 : index
    %31 = vector.load %arg8[%c0_18, %c0_19, %c0_20] : memref<1x8x8xf32, #tpu.memory_space<vmem>>, vector<1x8x8xf32>
    %32 = vector.shape_cast %31 : vector<1x8x8xf32> to vector<8x8xf32>
    %33 = vector.shape_cast %30 : vector<8x8xf32> to vector<1x8x8xf32>
    tpu.vector_store %arg8[%c0_18, %c0_19, %c0_20], %33 {strides = array<i32>} : memref<1x8x8xf32, #tpu.memory_space<vmem>>, vector<1x8x8xf32>,
    %34 = arith.truncf %30 : vector<8x8xf32> to vector<8x8xbf16>
    %cst_21 = arith.constant dense<0.000000e+00> : vector<8x32xf32>
    %35 = tpu.matmul %34, %9, %cst_21 {dimension_numbers = #tpu.dot_dimension_numbers<[1], [0], [0], [1], [0, 0, 1, 1], [], []>} : vector<8x8xbf16>, vector<8x32xbf16>, vector<8x32xf32> -> vector<8x32xf32>
    %c0_22 = arith.constant 0 : index
    %c0_23 = arith.constant 0 : index
    %c0_24 = arith.constant 0 : index
    %36 = vector.load %arg7[%c0_22, %c0_23, %c0_24] : memref<1x8x32xf32, #tpu.memory_space<vmem>>, vector<1x8x32xf32>
    %37 = vector.shape_cast %36 : vector<1x8x32xf32> to vector<8x32xf32>
    %38 = vector.shape_cast %35 : vector<8x32xf32> to vector<1x8x32xf32>
    tpu.vector_store %arg7[%c0_22, %c0_23, %c0_24], %38 {strides = array<i32>} : memref<1x8x32xf32, #tpu.memory_space<vmem>>, vector<1x8x32xf32>,
    return
  }
  func.func @transform_0(%arg0: i32, %arg1: i32) -> (i32, i32, i32) {
    %c0_i32 = arith.constant 0 : i32
    %c0_i32_0 = arith.constant 0 : i32
    return %arg0, %arg1, %c0_i32 : i32, i32, i32
  }
  func.func @transform_1(%arg0: i32, %arg1: i32) -> (i32, i32, i32) {
    %c0_i32 = arith.constant 0 : i32
    %c0_i32_0 = arith.constant 0 : i32
    %c0_i32_1 = arith.constant 0 : i32
    return %arg0, %c0_i32, %c0_i32_0 : i32, i32, i32
  }
  func.func @transform_2(%arg0: i32, %arg1: i32) -> (i32, i32, i32) {
    %c0_i32 = arith.constant 0 : i32
    %c0_i32_0 = arith.constant 0 : i32
    %c0_i32_1 = arith.constant 0 : i32
    return %arg0, %c0_i32, %c0_i32_0 : i32, i32, i32
  }
  func.func @transform_3(%arg0: i32, %arg1: i32) -> (i32, i32, i32) {
    %c0_i32 = arith.constant 0 : i32
    %c0_i32_0 = arith.constant 0 : i32
    return %arg0, %arg1, %c0_i32 : i32, i32, i32
  }
  func.func @transform_4(%arg0: i32, %arg1: i32) -> (i32, i32, i32) {
    %c0_i32 = arith.constant 0 : i32
    %c0_i32_0 = arith.constant 0 : i32
    return %arg0, %arg1, %c0_i32 : i32, i32, i32
  }
  func.func @transform_5(%arg0: i32, %arg1: i32) -> (i32, i32, i32) {
    %c0_i32 = arith.constant 0 : i32
    %c0_i32_0 = arith.constant 0 : i32
    return %arg0, %arg1, %c0_i32 : i32, i32, i32
  }
  func.func @transform_6(%arg0: i32, %arg1: i32) -> (i32, i32, i32) {
    %c0_i32 = arith.constant 0 : i32
    %c0_i32_0 = arith.constant 0 : i32
    return %arg0, %arg1, %c0_i32 : i32, i32, i32
  }
}

</mosaic_0001>

<bundles_post_ra>
// kernel: tpu_custom_call.1
= control target key start
LH: loop header
LB: loop body
LE: loop exit
PB: predicated region body
PF: predicated region fallthrough
CT: control target
= control target key end

     0   :  { %s1544_s0 = inlined_call_operand.hbm [shape: bf16[4,8,32], index: 0, kind: input, shape index: {}]   ;;  %s1545_s1 = inlined_call_operand.hbm [shape: bf16[4,8,32], index: 1, kind: input, shape index: {}]   ;;  %s1546_s2 = inlined_call_operand.hbm [shape: bf16[4,8,32], index: 2, kind: input, shape index: {}]   ;;  %s1547_s3 = inlined_call_operand.vmem [shape: s8[4,8,8], index: 3, kind: input, shape index: {}]   ;;  %s1548_s4 = inlined_call_operand.hbm [shape: f32[4,8,8], index: 4, kind: output, shape index: {0}]   ;;  %s1549_s5 = inlined_call_operand.hbm [shape: f32[4,8,32], index: 5, kind: output, shape index: {1}]   ;;  %s1550_s6 = inlined_call_operand.hbm [shape: f32[4,8,8], index: 6, kind: output, shape index: {2}]  }
   0x1   :  { %1562 = sst [smem:[#allocation22_spill]] %s1545_s1 }
   0x2   :  { %12 = vsyncpa [#allocation3], 0 }
   0x3   :  { %14 = vsyncpa [#allocation3 + $0x1], 0 }
   0x4   :  { %15 = vsyncpa [#allocation6], 0 }
   0x5   :  { %17 = vsyncpa [#allocation6 + $0x1], 0 }
   0x6   :  { %18 = vsyncpa [#allocation4], 0 }
   0x7   :  { %20 = vsyncpa [#allocation4 + $0x1], 0 }
   0x8   :  { %21 = vsyncpa [#allocation10], 0 }
   0x9   :  { %23 = vsyncpa [#allocation10 + $0x1], 0  ;;  %s1193_s21 = smov 0   ;;  %s1195_s22 = smov 0  }
   0xa   :  { %s1197_s23 = smov 0   ;;  %s1199_s24 = smov 0  }
   0xb   :  { %s1201_s25 = smov 0   ;;  %s1203_s26 = smov 0  }
   0xc LB: > { %1563 = sst [smem:[#allocation16_spill]] %s1128_s21  ;;  %s1224_s27 = sadd.s32 4294967295, %s1148_s26   ;;  %s1148_s26 = sphi %s1203_s26, %s29_s26   ;;  %s1144_s25 = sphi %s1201_s25, %s1591_s25   ;;  %s1140_s24 = sphi %s1199_s24, %s1590_s24   ;;  %s1136_s23 = sphi %s1197_s23, %s1594_s23   ;;  %s1132_s22 = sphi %s1195_s22, %s1593_s22   ;;  %s1128_s21 = sphi %s1193_s21, %s1592_s21  }
   0xd   : > { %1564 = sst [smem:[#allocation17_spill]] %s1144_s25  ;;  %s1551_s28 = sadd.s32 4294967294, %s1148_s26  }
   0xe   : > { %1565 = sst [smem:[#allocation18_spill]] %s1148_s26  ;;  %s41_s29 = sadd.s32 1, %s1144_s25 }
   0xf   : > { %s50_s30 = sadd.s32 1, %s1136_s23  ;;  %p43_p0 = scmp.ge.s32.totalorder %s41_s29, 4 }
  0x10   : > { %p57_p1 = scmp.ne.s32.totalorder %s1136_s23, %s1132_s22  ;;  %p58_p2 = scmp.eq.s32.totalorder %s1148_s26, 0 }
  0x11   : > { %p63_p3 = scmp.ne.s32.totalorder %s1132_s22, %s1128_s21  ;;  %s1596_s29 = smov (%p43_p0, %s41_s29), 0 }
  0x12   : > { %1566 = sst [smem:[#allocation19_spill]] %s1596_s29  ;;  %p1236_p4 = por %p58_p2, %p57_p1 }
  0x13   : > { %p64_p5 = scmp.eq.s32.totalorder %s1224_s27, 0  ;;  %s45_s8 = ssub.s32 %s1144_s25, %s1596_s29 }
  0x14   : > { %p169_p6 = scmp.eq.s32.totalorder %s1224_s27, 3  ;;  %p48_p7 = scmp.eq.s32.totalorder %s45_s8, 0 }
  0x15   : > { %p1244_p8 = por %p64_p5, %p63_p3  ;;  %p175_p10 = scmp.eq.s32.totalorder %s1551_s28, 3 }
  0x16   : > { %p1248_p9 = por %p169_p6, %p57_p1  ;;  %p856_p12 = scmp.lt.s32.totalorder %s1148_s26, 4 }
  0x17   : > { %s1568_s9 = scalar_select %p1244_p8, 1, 0 }
  0x18   : > { %s1569_s10 = scalar_select %p1248_p9, 1, 0 }
  0x19   : > { %s1255_s11 = scalar_select %p48_p7, %s1136_s23, %s50_s30  }
  0x1a   : > { %p1257_p11 = por %p175_p10, %p63_p3  ;;  %s1552_s13 = sand.u32 1, %s1136_s23  }
  0x1b   : > { %1570 = sst [smem:[#allocation20_spill]] %s1255_s11  ;;  %s1265_s14 = sshll.u32 %s1552_s13, 2 }
  0x1c   : > { %s1571_s12 = scalar_select %p1257_p11, 1, 0 }
  0x1d   : > { %s1268_s15 = sshll.u32 %s1144_s25, 6  ;;  %p1272_p13 = pnand %p856_p12, %p1236_p4 }
  0x1e   : > { %1572 = sst [smem:[#allocation21_spill]] %s1571_s12  ;;  %s270_s17 = sand.u32 1, %s1148_s26  }
  0x1f   : > { %s1573_s16 = scalar_select %p1272_p13, 1, 0 }
  0x20   : > { %s1574_s1 = sld [smem:[#allocation22_spill]]  ;;  %s274_s30 = scalar_lea.vmem [#allocation5], %s1265_s14 }
  0x21   : > { %s281_s8 = sshll.u32 %s274_s30, 4  ;;  %s1288_s7 = scalar_lea.sflag [#allocation6], %s270_s17  ;;  %s1285_s8 = int_to_ptr.vmem [resolvable:$true] %s281_s8 }
  0x22   : > { %p1294_p3 = pneg %p1272_p13 }
  0x26   : > { %s1281_s20 = scalar_lea.hbm %s1574_s1, %s1268_s15  ;;  %s917_s30 = scalar_lea.hbm %s1574_s1, 256 }
  0x27   : > { %s912_s28 = scalar_lea.hbm %s1281_s20, 64  ;;  %p918_p6 = scmp.lt.u32.totalorder %s1281_s20, %s1574_s1 }
  0x28   : > { %p913_p2 = scmp.ne.s32.totalorder %s1281_s20, %s912_s28  ;;  %p919_p7 = scmp.lt.u32.totalorder %s917_s30, %s912_s28 }
  0x29   : > { %p921_p12 = scmp.lt.u32.totalorder %s912_s28, %s1281_s20 }
  0x2a   : > { %p915_p4 = pnand %p1294_p3, %p913_p2  ;;  %p920_p10 = por %p919_p7, %p918_p6 }
  0x2c   : > { %p916_p5 = pneg %p915_p4  ;;  %p922_p0 = por %p921_p12, %p920_p10 }
  0x2e   : > { %p923_p1 = pnand %p922_p0, %p916_p5 }
  0x30   : > { %926 = shalt.err (!%p923_p1)
}
  0x31   : > { %s927_s17 = scalar_lea.vmem %s1285_s8, 64  ;;  %s1150_s18 = smov [#allocation5]  }
  0x32   : > { %p928_p2 = scmp.ne.s32.totalorder %s1285_s8, %s927_s17  ;;  %s932_s19 = sshll.u32 %s1150_s18, 4  ;;  %s933_s19 = int_to_ptr.vmem [resolvable:$false] %s932_s19 }
  0x33   : > { %s934_s25 = scalar_lea.vmem %s933_s19, 128  ;;  %p935_p9 = scmp.lt.s32.totalorder %s1285_s8, %s933_s19 }
  0x34   : > { %p930_p4 = pnand %p928_p2, %p1294_p3  ;;  %p936_p8 = scmp.lt.s32.totalorder %s934_s25, %s927_s17 }
  0x36   : > { %p931_p11 = pneg %p930_p4  ;;  %p937_p6 = por %p936_p8, %p935_p9 }
  0x38   : > { %p938_p7 = pnand %p937_p6, %p931_p11 }
  0x3a   : > { %941 = shalt.err (!%p938_p7)
}
  0x3b   : > { %842 = dma.hbm_to_vmem [thread:$0]  (!%p1272_p13), %s1281_s20, 64, %s1285_s8, %s1288_s7  }
  0x3c   : > { %p1576_p0 = scmp.lt.s32.totalorder %s1148_s26, 5  ;;  %p1577_p1 = scmp.ge.s32.totalorder %s1148_s26, 1 }
  0x3d   : > { %s1330_s17 = scalar_lea.hbm %s1544_s0, %s1268_s15  ;;  %s255_s18 = scalar_lea.vmem [#allocation2], %s1265_s14 }
  0x3e   : > { %p1322_p5 = pnand %p1577_p1, %p1576_p0  ;;  %s263_s19 = sshll.u32 %s255_s18, 4  ;;  %s1333_s19 = int_to_ptr.vmem [resolvable:$true] %s263_s19 }
  0x3f   : > { %s1339_s25 = scalar_lea.hbm %s1546_s2, %s1268_s15  ;;  %s1579_s1 = sand.u32 1, %s1136_s23  }
  0x40   : > { %s1578_s28 = scalar_select %p1322_p5, 1, 0 }
  0x41   : > { %s252_s11 = scalar_lea.sflag [#allocation3], %s1579_s1  ;;  %s942_s12 = scalar_lea.hbm %s1330_s17, 64 }
  0x42   : > { %p943_p8 = scmp.ne.s32.totalorder %s1330_s17, %s942_s12  ;;  %s947_s21 = scalar_lea.hbm %s1544_s0, 256 }
  0x43   : > { %p948_p10 = scmp.lt.u32.totalorder %s1330_s17, %s1544_s0  ;;  %p949_p12 = scmp.lt.u32.totalorder %s947_s21, %s942_s12 }
  0x44   : > { %p945_p9 = pnand %p943_p8, %p1294_p3  ;;  %p951_p4 = scmp.lt.u32.totalorder %s942_s12, %s1330_s17 }
  0x45   : > { %p950_p2 = por %p949_p12, %p948_p10 }
  0x46   : > { %p946_p11 = pneg %p945_p9 }
  0x47   : > { %p952_p6 = por %p951_p4, %p950_p2 }
  0x49   : > { %p953_p7 = pnand %p952_p6, %p946_p11 }
  0x4b   : > { %956 = shalt.err (!%p953_p7)
}
  0x4c   : > { %s957_s1 = scalar_lea.vmem %s1333_s19, 64  ;;  %s1151_s15 = smov [#allocation2]  }
  0x4d   : > { %p958_p0 = scmp.ne.s32.totalorder %s1333_s19, %s957_s1  ;;  %s962_s20 = sshll.u32 %s1151_s15, 4  ;;  %s963_s20 = int_to_ptr.vmem [resolvable:$false] %s962_s20 }
  0x4e   : > { %s964_s26 = scalar_lea.vmem %s963_s20, 128  ;;  %p965_p9 = scmp.lt.s32.totalorder %s1333_s19, %s963_s20 }
  0x4f   : > { %p960_p1 = pnand %p958_p0, %p1294_p3  ;;  %p966_p5 = scmp.lt.s32.totalorder %s964_s26, %s957_s1 }
  0x51   : > { %p961_p8 = pneg %p960_p1  ;;  %p967_p10 = por %p966_p5, %p965_p9 }
  0x53   : > { %p968_p12 = pnand %p967_p10, %p961_p8 }
  0x55   : > { %971 = shalt.err (!%p968_p12)
}
  0x56   : > { %839 = dma.hbm_to_vmem [thread:$0]  (!%p1272_p13), %s1330_s17, 64, %s1333_s19, %s252_s11  }
  0x57   : > { %s292_s21 = scalar_lea.vmem [#allocation7], %s1265_s14  ;;  %s972_s8 = scalar_lea.hbm %s1339_s25, 64 }
  0x58   : > { %s299_s12 = sshll.u32 %s292_s21, 4  ;;  %p973_p11 = scmp.ne.s32.totalorder %s1339_s25, %s972_s8  ;;  %s300_s12 = int_to_ptr.vmem [resolvable:$true] %s299_s12 }
  0x59   : > { %s977_s18 = scalar_lea.hbm %s1546_s2, 256  ;;  %p978_p4 = scmp.lt.u32.totalorder %s1339_s25, %s1546_s2 }
  0x5a   : > { %p975_p5 = pnand %p973_p11, %p1294_p3  ;;  %p979_p6 = scmp.lt.u32.totalorder %s977_s18, %s972_s8 }
  0x5b   : > { %p981_p0 = scmp.lt.u32.totalorder %s972_s8, %s1339_s25 }
  0x5c   : > { %p976_p2 = pneg %p975_p5  ;;  %p980_p7 = por %p979_p6, %p978_p4 }
  0x5e   : > { %p982_p1 = por %p981_p0, %p980_p7 }
  0x60   : > { %p983_p8 = pnand %p982_p1, %p976_p2 }
  0x62   : > { %986 = shalt.err (!%p983_p8)
}
  0x63   : > { %s987_s11 = scalar_lea.vmem %s300_s12, 64  ;;  %s1152_s14 = smov [#allocation7]  }
  0x64   : > { %p988_p9 = scmp.ne.s32.totalorder %s300_s12, %s987_s11  ;;  %s992_s17 = sshll.u32 %s1152_s14, 4  ;;  %s993_s17 = int_to_ptr.vmem [resolvable:$false] %s992_s17 }
  0x65   : > { %s994_s19 = scalar_lea.vmem %s993_s17, 128  ;;  %p995_p11 = scmp.lt.s32.totalorder %s300_s12, %s993_s17 }
  0x66   : > { %p990_p10 = pnand %p988_p9, %p1294_p3  ;;  %p996_p5 = scmp.lt.s32.totalorder %s994_s19, %s987_s11 }
  0x68   : > { %p991_p12 = pneg %p990_p10  ;;  %p997_p13 = por %p996_p5, %p995_p11 }
  0x6a   : > { %p998_p4 = pnand %p997_p13, %p991_p12 }
  0x6c   : > { %1001 = shalt.err (!%p998_p4)
}
  0x6d   : > { %p1580_p6 = scmp.ne.s32.totalorder %s1573_s16, 0  ;;  %p1581_p2 = scmp.ne.s32.totalorder %s1578_s28, 0 }
  0x6e   : > { %s1386_s13 = sand.u32 (!%p1581_p2), 1, %s1132_s22   ;;  %p1582_p13 = scmp.ne.s32.totalorder (!%p1581_p2), %s1568_s9, 0 }
  0x6f   : > { %845 = dma.hbm_to_vmem [thread:$0]  (!%p1580_p6), %s1339_s25, 64, %s300_s12, %s1288_s7  }
  0x70   : > { %318 = sbr.rel (%p1581_p2) target bundleno = 911 (0x38f), region = 36  ;;  %s1389_s20 = sshll.u32 (!%p1581_p2), %s1386_s13, 2 }
  0x71   : > { %s321_s26 = scalar_lea.sflag (!%p1581_p2), [#allocation3], %s1386_s13  ;;  %s324_s21 = scalar_lea.vmem (!%p1581_p2), [#allocation2], %s1389_s20 }
  0x77   : > { %1111 = dma.done.wait (%p1582_p13), %s321_s26, 64  }
  0x78   : > { %1113 = vsyncadd (%p1582_p13), %s321_s26, 4294967232  ;;  %s329_s16 = sand.u32 1, %s1224_s27   ;;  %s333_s28 = scalar_lea.vmem [#allocation5], %s1389_s20 }
  0x79   : > { %s330_s7 = scalar_lea.sflag [#allocation6], %s329_s16 }
  0x7a   : > { %1115 = dma.done.wait (%p1582_p13), %s330_s7, 128  }
  0x7b   : > { %1117 = vsyncadd (%p1582_p13), %s330_s7, 4294967168  ;;  %v1153_v0 = vmov 0.0   ;;  %vm1154_vm0 = vmmov 0   ;;  %vm412_vm1 = vcmask 261120   ;;  %v410_v1 = vld [vmem:[%s333_s28] sm:$0xf] }
  0x7c   : > { %812 = vmatprep.subr.bf16.mxu0 %v1153_v0  ;;  %814 = vmatprep.mubr.msk.bf16.mxu0 %vm1154_vm0, %v1153_v0  ;;  %v406_v2 = vld [vmem:[%s324_s21] sm:$0xf]  ;;  %v417_v3 = vsel %vm412_vm1, %v410_v1, 0  ;;  %p398_p3 = scmp.lt.s32.totalorder %s1140_s24, 3  ;;  %s1413_s30 = sshll.u32 %s1386_s13, 3  ;;  %vm463_vm3 = vcmask 64512  }
  0x7d   : > { %818 = vmatprep.subr.bf16.mxu1 %v1153_v0  ;;  %820 = vmatprep.mubr.msk.bf16.mxu1 %vm1154_vm0, %v1153_v0  ;;  %v407_v4 = vunpack.c.l.bf16 %v406_v2  ;;  %s383_s18 = scalar_lea.vmem [#allocation8], %s1413_s30  ;;  %vm481_vm4 = vcmask 1043456   ;;  %s342_s1 = scalar_lea.vmem [#allocation7], %s1389_s20 }
  0x7e   : > { %813 = vmatpush3.bf16.xpose.msra.mxu0 %v417_v3  ;;  %s399_s9 = scalar_select %p398_p3, %s1140_s24, 3  ;;  %v411_v20 = vld [vmem:[%s342_s1] sm:$0xf] }
  0x7f   : > { %v408_v5 = vmul.f32 0.17677669, %v407_v4  ;;  %v483_v21 = vsel %vm481_vm4, %v411_v20, 0  ;;  %s397_s15 = scalar_lea.vmem [#allocation11], %s1413_s30  ;;  %s1426_s11 = sshll.u32 %s1140_s24, 7 }
  0x80   : > { %s797_s25 = sshll.u32 %s399_s9, 1  ;;  %819 = vmatpush3.bf16.msra.mxu1 %v483_v21  ;;  %s1432_s19 = scalar_lea.hbm %s1548_s4, %s1426_s11 }
  0x81   : > { %v409_v6 = vpack.c.bf16 %v408_v5, %v408_v5  ;;  %s404_s29 = scalar_lea.vmem %s1547_s3, %s797_s25  ;;  %s551_s20 = sshll.u32 %s383_s18, 4  ;;  %s552_s20 = int_to_ptr.vmem [resolvable:$true] %s551_s20 }
  0x82   : > { %v459_v7 = vld [vmem:[%s404_s29] sm:$0x3]  ;;  %s527_s26 = scalar_lea.sflag [#allocation4], %s1386_s13  ;;  %s1002_s21 = scalar_lea.vmem %s552_s20, 128 }
  0x83   : > { %v460_v8 = vunpack.c.0.s8 %v459_v7  ;;  %p1003_p7 = scmp.ne.s32.totalorder %s552_s20, %s1002_s21  ;;  %p1583_p0 = scmp.ne.s32.totalorder %s1569_s10, 0 }
  0x84   : > { %s1155_s7 = smov [#allocation8]  }
  0x85   : > { %815 = vmatmul.mubr.msk.bf16.vlgmr.msra.gmra.mrb[0].mxu0 %vm412_vm1, %v409_v6  ;;  %vm461_vm2 = vcmp.ne.s32.totalorder %v460_v8, 0  ;;  %p1004_p1 = pnand %p1003_p7, %p1583_p0  ;;  %s1006_s28 = sshll.u32 %s1155_s7, 4  ;;  %s1007_s28 = int_to_ptr.vmem [resolvable:$false] %s1006_s28 }
  0x86   : > { %s1008_s9 = scalar_lea.vmem %s1007_s28, 256  ;;  %p1009_p9 = scmp.lt.s32.totalorder %s552_s20, %s1007_s28 }
  0x87   : > { %p1005_p8 = pneg %p1004_p1  ;;  %p1010_p10 = scmp.lt.s32.totalorder %s1008_s9, %s1002_s21 }
  0x89   : > { %p1011_p12 = por %p1010_p10, %p1009_p9 }
  0x8b   : > { %p1012_p11 = pnand %p1011_p12, %p1005_p8 }
 0x158   : > { %v453_v9 = vpop.f32.mrb[0].mxu0 }
 0x159   : > { %v462_v10 = vsel %vm461_vm2, -1e+09, %v453_v9  ;;  %v816_v11 = vpop.f32.mrb[1].mxu0 }
 0x15a   : > { %464 = vst.msk [vmem:[%s383_s18] sm:$0xff] %vm463_vm3, %v462_v10  ;;  %v456_v12 = vpop.f32.mrb[2].mxu0  ;;  %v465_v13 = vsel %vm463_vm3, %v462_v10, -inf }
 0x15b   : > { %466 = vmax.xlane.f32.xlu0 %v465_v13  ;;  %v817_v14 = vpop.f32.mrb[3].mxu0 }
 0x1e8   : > { %v467_v15 = vpop.xlane.xlu0 %466 }
 0x1e9   : > { %v468_v16 = vsub.f32 %v462_v10, %v467_v15 }
 0x1eb   : > { %v469_v17 = vmul.f32 1.442695, %v468_v16 }
 0x1ed   : > { %908 = vpow2.f32 %v469_v17 }
 0x1f7   : > { %v909_v18 = vpop.eup %908 }
 0x1f8   : > { %v471_v19 = vsel %vm463_vm3, %v909_v18, 0.0 }
 0x1f9   : > { %472 = vadd.xlane.f32.xlu0 %v471_v19 }
 0x286   : > { %v473_v22 = vpop.xlane.xlu0 %472 }
 0x287   : > { %910 = vrcp.f32 %v473_v22 }
 0x291   : > { %v911_v23 = vpop.eup %910 }
 0x292   : > { %v475_v24 = vmul.f32 %v911_v23, %v909_v18 }
 0x294   : > { %v477_v25 = vpack.c.bf16 %v475_v24, %v475_v24  ;;  %476 = vst.msk [vmem:[%s397_s15] sm:$0xff] %vm463_vm3, %v475_v24 }
 0x296   : > { %821 = vmatmul.mubr.msk.bf16.vlgmr.msra.gmra.mrb[0].mxu1 %vm463_vm3, %v477_v25 }
 0x297   : > { %1015 = shalt.err (!%p1012_p11)
}
 0x298   : > { %s1016_s24 = scalar_lea.hbm %s1432_s19, 128  ;;  %s1020_s12 = scalar_lea.hbm %s1548_s4, 512 }
 0x299   : > { %p1017_p5 = scmp.ne.s32.totalorder %s1432_s19, %s1016_s24  ;;  %p1021_p2 = scmp.lt.u32.totalorder %s1432_s19, %s1548_s4 }
 0x29a   : > { %p1022_p13 = scmp.lt.u32.totalorder %s1020_s12, %s1016_s24  ;;  %p1024_p7 = scmp.lt.u32.totalorder %s1016_s24, %s1432_s19 }
 0x29b   : > { %p1018_p4 = pnand %p1017_p5, %p1583_p0 }
 0x29c   : > { %p1023_p3 = por %p1022_p13, %p1021_p2 }
 0x29d   : > { %p1019_p6 = pneg %p1018_p4 }
 0x29e   : > { %p1025_p1 = por %p1024_p7, %p1023_p3 }
 0x2a0   : > { %p1026_p8 = pnand %p1025_p1, %p1019_p6 }
 0x2a2   : > { %1029 = shalt.err (!%p1026_p8)
}
 0x2a3   : > { %830 = dma.vmem_to_hbm [thread:$0]  (%p1583_p0), %s552_s20, 128, %s1432_s19, %s527_s26  }
 0x2a4   : > { %s390_s18 = scalar_lea.vmem [#allocation9], %s1413_s30  ;;  %s579_s14 = sshll.u32 %s397_s15, 4  ;;  %s1469_s14 = int_to_ptr.vmem [resolvable:$true] %s579_s14 }
 0x2a5   : > { %s565_s1 = sshll.u32 %s390_s18, 4  ;;  %s1459_s7 = scalar_lea.hbm %s1549_s5, %s1426_s11  ;;  %s1461_s1 = int_to_ptr.vmem [resolvable:$true] %s565_s1 }
 0x2a6   : > { %s1467_s24 = scalar_lea.hbm %s1550_s6, %s1426_s11  ;;  %s1474_s30 = scalar_lea.sflag [#allocation10], %s329_s16 }
 0x2a7   : > { %s1030_s15 = scalar_lea.vmem %s1461_s1, 128  ;;  %s1156_s19 = smov [#allocation9]  }
 0x2a8   : > { %p1031_p9 = scmp.ne.s32.totalorder %s1461_s1, %s1030_s15  ;;  %s1034_s20 = sshll.u32 %s1156_s19, 4  ;;  %s1035_s20 = int_to_ptr.vmem [resolvable:$false] %s1034_s20 }
 0x2a9   : > { %s1036_s26 = scalar_lea.vmem %s1035_s20, 256  ;;  %p1037_p11 = scmp.lt.s32.totalorder %s1461_s1, %s1035_s20 }
 0x2aa   : > { %p1032_p10 = pnand %p1031_p9, %p1583_p0  ;;  %p1038_p5 = scmp.lt.s32.totalorder %s1036_s26, %s1030_s15 }
 0x2ac   : > { %p1033_p12 = pneg %p1032_p10  ;;  %p1039_p4 = por %p1038_p5, %p1037_p11 }
 0x2ae   : > { %p1040_p6 = pnand %p1039_p4, %p1033_p12 }
 0x369   : > { %v519_v26 = vpop.f32.mrb[0].mxu1 }
 0x36a   : > { %525 = vst.msk [vmem:[%s390_s18] sm:$0xff] %vm412_vm1, %v519_v26  ;;  %v822_v27 = vpop.f32.mrb[1].mxu1 }
 0x36b   : > { %v522_v28 = vpop.f32.mrb[2].mxu1 }
 0x36c   : > { %1043 = shalt.err (!%p1040_p6)
}
 0x36d   : > { %s1044_s27 = scalar_lea.hbm %s1459_s7, 128  ;;  %s1048_s13 = scalar_lea.hbm %s1549_s5, 512 }
 0x36e   : > { %p1045_p2 = scmp.ne.s32.totalorder %s1459_s7, %s1044_s27  ;;  %p1049_p7 = scmp.lt.u32.totalorder %s1459_s7, %s1549_s5 }
 0x36f   : > { %p1050_p1 = scmp.lt.u32.totalorder %s1048_s13, %s1044_s27  ;;  %p1052_p9 = scmp.lt.u32.totalorder %s1044_s27, %s1459_s7 }
 0x370   : > { %p1046_p13 = pnand %p1045_p2, %p1583_p0 }
 0x371   : > { %p1051_p8 = por %p1050_p1, %p1049_p7 }
 0x372   : > { %p1047_p3 = pneg %p1046_p13 }
 0x373   : > { %p1053_p10 = por %p1052_p9, %p1051_p8 }
 0x375   : > { %p1054_p12 = pnand %p1053_p10, %p1047_p3 }
 0x377   : > { %1057 = shalt.err (!%p1054_p12)
}
 0x378   : > { %831 = dma.vmem_to_hbm [thread:$0]  (%p1583_p0), %s1461_s1, 128, %s1459_s7, %s1474_s30   ;;  %v823_v29 = vpop.f32.mrb[3].mxu1 }
 0x379   : > { %s1058_s8 = scalar_lea.vmem %s1469_s14, 128  ;;  %s1157_s29 = smov [#allocation11]  }
 0x37a   : > { %p1059_p11 = scmp.ne.s32.totalorder %s1469_s14, %s1058_s8  ;;  %s1062_s18 = sshll.u32 %s1157_s29, 4  ;;  %s1063_s18 = int_to_ptr.vmem [resolvable:$false] %s1062_s18 }
 0x37b   : > { %s1064_s17 = scalar_lea.vmem %s1063_s18, 256  ;;  %p1065_p6 = scmp.lt.s32.totalorder %s1469_s14, %s1063_s18 }
 0x37c   : > { %p1060_p5 = pnand %p1059_p11, %p1583_p0  ;;  %p1066_p2 = scmp.lt.s32.totalorder %s1064_s17, %s1058_s8 }
 0x37e   : > { %p1061_p4 = pneg %p1060_p5  ;;  %p1067_p13 = por %p1066_p2, %p1065_p6 }
 0x380   : > { %p1068_p3 = pnand %p1067_p13, %p1061_p4 }
 0x382   : > { %1071 = shalt.err (!%p1068_p3)
}
 0x383   : > { %s1072_s1 = scalar_lea.hbm %s1467_s24, 128  ;;  %s1076_s28 = scalar_lea.hbm %s1550_s6, 512 }
 0x384   : > { %p1073_p7 = scmp.ne.s32.totalorder %s1467_s24, %s1072_s1  ;;  %p1077_p9 = scmp.lt.u32.totalorder %s1467_s24, %s1550_s6 }
 0x385   : > { %p1078_p10 = scmp.lt.u32.totalorder %s1076_s28, %s1072_s1  ;;  %p1080_p11 = scmp.lt.u32.totalorder %s1072_s1, %s1467_s24 }
 0x386   : > { %p1074_p1 = pnand %p1073_p7, %p1583_p0 }
 0x387   : > { %p1079_p12 = por %p1078_p10, %p1077_p9 }
 0x388   : > { %p1075_p8 = pneg %p1074_p1 }
 0x389   : > { %p1081_p5 = por %p1080_p11, %p1079_p12 }
 0x38b   : > { %p1082_p4 = pnand %p1081_p5, %p1075_p8 }
 0x38d   : > { %1085 = shalt.err (!%p1082_p4)
}
 0x38e   : > { %832 = dma.vmem_to_hbm [thread:$0]  (%p1583_p0), %s1469_s14, 128, %s1467_s24, %s1474_s30  }
 0x38f PF: > { %s1584_s19 = sld [smem:[#allocation18_spill]]  ;;  %s1585_s20 = sld [smem:[#allocation16_spill]] }
 0x390   : > { %s1586_s26 = sld [smem:[#allocation21_spill]] }
 0x395   : > { %p857_p6 = scmp.ge.s32.totalorder %s1584_s19, 2  ;;  %s591_s27 = sand.u32 1, %s1585_s20  }
 0x396   : > { %p1587_p2 = scmp.ne.s32.totalorder %s1586_s26, 0  ;;  %s592_s16 = scalar_lea.sflag [#allocation4], %s591_s27 }
 0x398   : > { %p847_p13 = pnand %p857_p6, %p1587_p2 }
 0x39a   : > { %1119 = dma.done.wait (!%p847_p13), %s592_s16, 128  }
 0x39b   : > { %1121 = vsyncadd (!%p847_p13), %s592_s16, 4294967168  ;;  %s1588_s11 = sadd.s32 4294967294, %s1584_s19  }
 0x39c   : > { %s600_s13 = sand.u32 1, %s1588_s11  }
 0x39d   : > { %s601_s25 = scalar_lea.sflag [#allocation10], %s600_s13 }
 0x39e   : > { %1123 = dma.done.wait (!%p847_p13), %s601_s25, 256  }
 0x39f   : > { %1125 = vsyncadd (!%p847_p13), %s601_s25, 4294967040  ;;  %s29_s26 = sadd.s32 1, %s1584_s19   ;;  %s1589_s10 = sld [smem:[#allocation20_spill]] }
 0x3a0   : > { %p26_p0 = scmp.ge.s32.totalorder %s29_s26, 6   ;;  %s1590_s24 = sld [smem:[#allocation17_spill]] }
 0x3a1   : > { %s1591_s25 = sld [smem:[#allocation19_spill]]  ;;  %s1592_s21 = smov %s1132_s22 }
 0x3a2   : > { %s1593_s22 = smov %s1136_s23  ;;  %28 = sbr.rel (!%p26_p0) target bundleno = 12 (0xc), region = 140 }
 0x3a5   : > { %s1594_s23 = smov %s1589_s10 }
 0x3a9   :  { %615 = vsyncpa [#allocation3], 1 }
 0x3aa   :  { %617 = vsyncpa [#allocation3 + $0x1], 1 }
 0x3ab   :  { %618 = vsyncpa [#allocation6], 1 }
 0x3ac   :  { %620 = vsyncpa [#allocation6 + $0x1], 1 }
 0x3ad   :  { %621 = vsyncpa [#allocation4], 1 }
 0x3ae   :  { %623 = vsyncpa [#allocation4 + $0x1], 1 }
 0x3af   :  { %624 = vsyncpa [#allocation10], 1 }
 0x3b0   :  { %626 = vsyncpa [#allocation10 + $0x1], 1 }

</bundles_post_ra>
